<compile_context>
chip_gen: v7x
topology: tpu7x:2x2x1
jax: 0.10.0
libtpu: 0.0.40
codegen_flags: <defaults>
</compile_context>

<pallas_src>
import jax
import jax.numpy as jnp
from jax.experimental import pallas as pl
from jax.experimental.pallas import tpu as pltpu


def _scale_kernel(scale_ref, x_ref, o_ref):
    # scale_ref: SMEM (1,) f32 scalar; x_ref / o_ref: VMEM tiles.
    s = scale_ref[0]  # loop-invariant scalar read from SMEM
    o_ref[...] = (x_ref[...].astype(jnp.float32) * s).astype(o_ref.dtype)


def _round_up(a: int, b: int) -> int:
    return ((a + b - 1) // b) * b


def _sublane_multiple(dtype) -> int:
    # 8 sublanes for 32-bit dtypes, 16 for 16-bit, 32 for 8-bit (packing).
    itemsize = jnp.dtype(dtype).itemsize
    return max(8, 32 // itemsize)


def scale_forward(x: jax.Array, scale: jax.Array) -> jax.Array:
    """Apply y = x * scale (scale is a learnable scalar parameter)."""
    orig_shape = x.shape
    total = x.size
    if total == 0:
        return x

    itemsize = jnp.dtype(x.dtype).itemsize
    sub = _sublane_multiple(x.dtype)

    # Lane width: largest multiple of 128 that divides the element count, so
    # the common case reshapes for free (no padding copy).
    C = None
    for c in (2048, 1024, 512, 256, 128):
        if total % c == 0:
            C = c
            break

    x_flat = x.reshape(-1)
    if C is None:
        # Ragged case only: pad to a multiple of 1024 (< 1024 wasted elems).
        C = 1024
        padded_total = _round_up(total, C)
        x_flat = jnp.pad(x_flat, (0, padded_total - total))
    else:
        padded_total = total

    rows = padded_total // C
    x2d = x_flat.reshape(rows, C)

    # Row-tile size: ~2 MiB per block, dtype-aware sublane multiple so every
    # block satisfies the (8,128) tiling rule with full-width stores.
    target_block_bytes = 2 * 1024 * 1024
    tm_target = max(sub, (target_block_bytes // (C * itemsize)) // sub * sub)
    if rows <= tm_target:
        # Single block covering all rows ("equal full dim" exception — no
        # divisibility requirement), still <= ~2 MiB so it fits VMEM.
        tm = rows
    else:
        tm = tm_target  # multiple of `sub`; Pallas masks the partial last block

    grid = (pl.cdiv(rows, tm),)

    out2d = pl.pallas_call(
        _scale_kernel,
        out_shape=jax.ShapeDtypeStruct((rows, C), x.dtype),
        grid_spec=pltpu.PrefetchScalarGridSpec(
            num_scalar_prefetch=0,
            grid=grid,
            in_specs=[
                # scale lives in SMEM (scalar path, off the per-vreg path).
                pl.BlockSpec(memory_space=pltpu.MemorySpace.SMEM),
                pl.BlockSpec((tm, C), lambda i: (i, 0)),
            ],
            out_specs=pl.BlockSpec((tm, C), lambda i: (i, 0)),
        ),
        compiler_params=pltpu.CompilerParams(
            dimension_semantics=("parallel",),
        ),
    )(scale.astype(jnp.float32).reshape(1), x2d)

    out_flat = out2d.reshape(-1)
    if padded_total != total:
        out_flat = out_flat[:total]
    return out_flat.reshape(orig_shape)


class ScalePallas:
    """Mirror of the PyTorch `Scale` module using a Pallas TPU kernel."""

    def __init__(self, scale: float = 1.0):
        # Matches nn.Parameter(torch.tensor(scale, dtype=torch.float)).
        self.scale = jnp.array([scale], dtype=jnp.float32)

    def __call__(self, x: jax.Array) -> jax.Array:
        return scale_forward(x, self.scale)


if __name__ == "__main__":
    key = jax.random.PRNGKey(0)
    x = jax.random.normal(key, (2, 4, 16, 16), dtype=jnp.float32)  # NCHW

    module = ScalePallas(scale=1.0)
    # Use a non-trivial scale value to actually exercise the multiply.
    module.scale = jnp.array([2.5], dtype=jnp.float32)

    y = module(x)
    y = jax.block_until_ready(y)

    # Reference check in plain JAX.
    y_ref = x * module.scale[0]
    assert y.shape == x.shape and y.dtype == x.dtype
    assert jnp.allclose(y, y_ref, atol=1e-6, rtol=1e-6)

    # Also exercise a ragged (non-multiple-of-128) shape -> padded path.
    x2 = jax.random.normal(jax.random.PRNGKey(1), (3, 5, 17, 31), dtype=jnp.float32)
    y2 = jax.block_until_ready(module(x2))
    assert jnp.allclose(y2, x2 * module.scale[0], atol=1e-6, rtol=1e-6)

    print("KERNEL_OK")
</pallas_src>

<mosaic_0001>
module attributes {stable_mosaic.version = 11 : i64} {
  func.func @_scale_kernel(%arg0: i32, %arg1: memref<1xf32, #tpu.memory_space<smem>>, %arg2: memref<1x2048xf32, #tpu.memory_space<vmem>>, %arg3: memref<1x2048xf32, #tpu.memory_space<vmem>>) attributes {dimension_semantics = [#tpu.dimension_semantics<parallel>], iteration_bounds = array<i64: 1>, scalar_prefetch = 0 : i64, scratch_operands = 0 : i64, tpu.core_type = #tpu.core_type<tc>, window_params = [{transform_indices = @transform_0, window_bounds = array<i64: 1>}, {transform_indices = @transform_1, window_bounds = array<i64: 1, 2048>}, {transform_indices = @transform_2, window_bounds = array<i64: 1, 2048>}]} {
    %c0 = arith.constant 0 : index
    %0 = memref.load %arg1[%c0] : memref<1xf32, #tpu.memory_space<smem>>
    %c0_0 = arith.constant 0 : index
    %c0_1 = arith.constant 0 : index
    %1 = vector.load %arg2[%c0_0, %c0_1] : memref<1x2048xf32, #tpu.memory_space<vmem>>, vector<1x2048xf32>
    %2 = vector.broadcast %0 : f32 to vector<1x2048xf32>
    %3 = arith.mulf %1, %2 : vector<1x2048xf32>
    %c0_2 = arith.constant 0 : index
    %c0_3 = arith.constant 0 : index
    %4 = vector.load %arg3[%c0_2, %c0_3] : memref<1x2048xf32, #tpu.memory_space<vmem>>, vector<1x2048xf32>
    tpu.vector_store %arg3[%c0_2, %c0_3], %3 {strides = array<i32>} : memref<1x2048xf32, #tpu.memory_space<vmem>>, vector<1x2048xf32>,
    return
  }
  func.func @transform_0(%arg0: i32) -> i32 {
    %c0_i32 = arith.constant 0 : i32
    %c0_i32_0 = arith.constant 0 : i32
    return %c0_i32 : i32
  }
  func.func @transform_1(%arg0: i32) -> (i32, i32) {
    %c0_i32 = arith.constant 0 : i32
    %c0_i32_0 = arith.constant 0 : i32
    return %arg0, %c0_i32 : i32, i32
  }
  func.func @transform_2(%arg0: i32) -> (i32, i32) {
    %c0_i32 = arith.constant 0 : i32
    %c0_i32_0 = arith.constant 0 : i32
    return %arg0, %c0_i32 : i32, i32
  }
}

</mosaic_0001>

<bundles_post_ra>
// kernel: tpu_custom_call.1
= control target key start
LH: loop header
LB: loop body
LE: loop exit
PB: predicated region body
PF: predicated region fallthrough
CT: control target
= control target key end

     0   :  { %8 = vsyncpa [#allocation4], 0  ;;  %s142_s0 = inlined_call_operand.<no memory space> [shape: f32[1], index: 0, kind: input, shape index: {}]   ;;  %s143_s1 = inlined_call_operand.hbm [shape: f32[1,2048], index: 1, kind: input, shape index: {}]   ;;  %s144_s2 = inlined_call_operand.hbm [shape: f32[1,2048], index: 2, kind: output, shape index: {}]  }
   0x1   :  { %9 = vsyncpa [#allocation5], 0  ;;  %s98_s9 = smov [#allocation3]   ;;  %s50_s13 = scalar_lea.hbm %s143_s1, 256 }
   0x2   :  { %s18_s10 = sshll.u32 %s98_s9, 4  ;;  %p51_p0 = scmp.ne.s32.totalorder %s143_s1, %s50_s13  ;;  %s19_s10 = int_to_ptr.vmem [resolvable:$true] %s18_s10 }
   0x3   :  { %p54_p1 = scmp.lt.u32.totalorder %s50_s13, %s143_s1 }
   0x5   :  { %p56_p2 = pnand %p54_p1, %p51_p0 }
   0x7   :  { %59 = shalt.err (!%p56_p2)
}
   0x8   :  { %s60_s18 = scalar_lea.vmem %s19_s10, 256  ;;  %p65_p4 = scmp.lt.s32.totalorder %s19_s10, %s19_s10 }
   0x9   :  { %p61_p3 = scmp.ne.s32.totalorder %s19_s10, %s60_s18  ;;  %p66_p5 = scmp.lt.s32.totalorder %s60_s18, %s60_s18 }
   0xb   :  { %p67_p6 = por %p66_p5, %p65_p4 }
   0xd   :  { %p68_p7 = pnand %p67_p6, %p61_p3 }
   0xf   :  { %71 = shalt.err (!%p68_p7)
}
  0x10   :  { %21 = dma.hbm_to_vmem [thread:$0]  %s143_s1, 256, %s19_s10, [#allocation4]  }
  0x11   :  { %94 = dma.done.wait [#allocation4], 256  }
  0x12   :  { %95 = vsyncadd [#allocation4], 4294967040  ;;  %v28_v0 = vstv %s142_s0  ;;  %s99_s23 = smov [#allocation6]   ;;  %v26_v1 = vld [vmem:[#allocation3] sm:$0xff]  ;;  %v27_v2 = vld [vmem:[#allocation3 + $0x8] sm:$0xff] }
  0x13   :  { %s39_s24 = sshll.u32 %s99_s23, 4  ;;  %v29_v3 = vmul.f32 %v28_v0, %v26_v1  ;;  %v30_v4 = vmul.f32 %v28_v0, %v27_v2  ;;  %s40_s24 = int_to_ptr.vmem [resolvable:$true] %s39_s24 }
  0x14   :  { %s72_s25 = scalar_lea.vmem %s40_s24, 256  ;;  %p77_p9 = scmp.lt.s32.totalorder %s40_s24, %s40_s24 }
  0x15   :  { %31 = vst [vmem:[#allocation6] sm:$0xff] %v29_v3  ;;  %32 = vst [vmem:[#allocation6 + $0x8] sm:$0xff] %v30_v4  ;;  %p73_p8 = scmp.ne.s32.totalorder %s40_s24, %s72_s25  ;;  %p78_p10 = scmp.lt.s32.totalorder %s72_s25, %s72_s25 }
  0x17   :  { %p79_p11 = por %p78_p10, %p77_p9 }
  0x19   :  { %p80_p12 = pnand %p79_p11, %p73_p8 }
  0x1b   :  { %83 = shalt.err (!%p80_p12)
}
  0x1c   :  { %s84_s0 = scalar_lea.hbm %s144_s2, 256 }
  0x1d   :  { %p85_p13 = scmp.ne.s32.totalorder %s144_s2, %s84_s0  ;;  %p88_p0 = scmp.lt.u32.totalorder %s84_s0, %s144_s2 }
  0x1f   :  { %p90_p1 = pnand %p88_p0, %p85_p13 }
  0x21   :  { %93 = shalt.err (!%p90_p1)
}
  0x22   :  { %42 = dma.vmem_to_hbm [thread:$0]  %s40_s24, 256, %s144_s2, [#allocation5]  }
  0x23   :  { %96 = dma.done.wait [#allocation5], 256  }
  0x24   :  { %97 = vsyncadd [#allocation5], 4294967040 }
  0x25   :  { %46 = vsyncpa [#allocation4], 1 }
  0x26   :  { %47 = vsyncpa [#allocation5], 1 }

</bundles_post_ra>
